<compile_context>
chip_gen: v6e
topology: v6e:2x2x1
jax: 0.10.0
libtpu: 0.0.40
codegen_flags: <defaults>
</compile_context>

<pallas_src>
import math
from functools import partial

import numpy as np
import jax
import jax.numpy as jnp
from jax.experimental import pallas as pl
from jax.experimental.pallas import tpu as pltpu


def _is_power_of_2(n):
    if not isinstance(n, int) or n < 0:
        raise ValueError('invalid input for _is_power_of_2: {} (type: {})'.format(n, type(n)))
    return n & (n - 1) == 0 and n != 0


# ----------------------------------------------------------------------------- helpers

def _vmem_capacity_bytes():
    # Trace-time hardware query; fall back to the v7x per-TensorCore figure (the
    # smallest of v5e/v6e/v7x) so the tiling plan always fits.
    try:
        return int(pltpu.get_tpu_info().vmem_capacity_bytes)
    except Exception:
        return 64 * 1024 * 1024


def _core_vmem_plan(Lq, S_total, C, shapes):
    """Pick the Lq tile and scoped-VMEM limit from the per-generation VMEM capacity."""
    cap = _vmem_capacity_bytes()
    budget = int(cap * 0.55)
    max_hw = max(h * w for h, w in shapes)
    val_bytes = S_total * C * 4                      # single-buffered value scratch

    def demand(t):
        # value scratch + ~4 live (t, max_hw) f32 temporaries (wy, wx, product, wmat)
        # + double-buffered loc/attn/out tiles (O(t*C)).
        return val_bytes + 4 * t * max_hw * 4 + 8 * t * C * 4

    lq_tile = min(Lq, 512)                           # v5e/v6e can afford large tiles
    while lq_tile > 8 and demand(lq_tile) > budget:  # v7x (64 MiB) shrinks automatically
        lq_tile //= 2
    if lq_tile < Lq:
        lq_tile = max(8, (lq_tile // 8) * 8)         # (8, 128) block-shape constraint
    lq_tile = min(lq_tile, Lq)
    vmem_limit = min(max(demand(lq_tile) + (8 << 20), 32 << 20), int(cap * 0.9))
    return lq_tile, int(vmem_limit)


# ----------------------------------------------------------------------------- kernels

def _linear_kernel(x_ref, w_ref, b_ref, o_ref):
    # y = x @ W + b   (row tile per grid step, W / b resident)
    o_ref[...] = (jnp.dot(x_ref[...], w_ref[...], preferred_element_type=jnp.float32)
                  + b_ref[...]).astype(o_ref.dtype)


def pallas_linear(x, w, b, row_tile=1024):
    rows, in_dim = x.shape
    out_dim = w.shape[1]
    tm = min(rows, row_tile)
    return pl.pallas_call(
        _linear_kernel,
        out_shape=jax.ShapeDtypeStruct((rows, out_dim), jnp.float32),
        grid_spec=pltpu.PrefetchScalarGridSpec(
            num_scalar_prefetch=0,
            grid=(pl.cdiv(rows, tm),),
            in_specs=[pl.BlockSpec((tm, in_dim), lambda i: (i, 0)),
                      pl.BlockSpec((in_dim, out_dim), lambda i: (0, 0)),
                      pl.BlockSpec((1, out_dim), lambda i: (0, 0))],
            out_specs=pl.BlockSpec((tm, out_dim), lambda i: (i, 0)),
        ),
        compiler_params=pltpu.CompilerParams(dimension_semantics=("parallel",)),
    )(x, w, b.reshape(1, out_dim))


def _qproj_kernel(x_ref, w_ref, b_ref, off_ref, attw_ref, *, n_heads, group, off_dim):
    # fused: [sampling_offsets | attention_weights] projection + per-head softmax
    z = jnp.dot(x_ref[...], w_ref[...], preferred_element_type=jnp.float32) + b_ref[...]
    off_ref[...] = z[:, :off_dim].astype(off_ref.dtype)
    a = z[:, off_dim:]
    tm = a.shape[0]
    # vectorized per-head softmax: single max/exp/sum pass over the group axis
    a3 = a.reshape(tm, n_heads, group)
    a3 = a3 - jnp.max(a3, axis=-1, keepdims=True)
    e = jnp.exp(a3)
    s = jnp.sum(e, axis=-1, keepdims=True)
    # TODO(synk): pl.reciprocal(s, approx=True) moves the divide to the idle EUP slot;
    # kept exact here to stay inside the 2e-4 correctness tolerance vs the f32 reference.
    attw_ref[...] = (e * pl.reciprocal(s, approx=False)).reshape(
        tm, n_heads * group).astype(attw_ref.dtype)


def pallas_query_proj(x, w, b, n_heads, group, off_dim, row_tile=1024):
    rows, in_dim = x.shape
    tot = w.shape[1]
    attw_dim = tot - off_dim
    tm = min(rows, row_tile)
    kernel = partial(_qproj_kernel, n_heads=n_heads, group=group, off_dim=off_dim)
    return pl.pallas_call(
        kernel,
        out_shape=(jax.ShapeDtypeStruct((rows, off_dim), jnp.float32),
                   jax.ShapeDtypeStruct((rows, attw_dim), jnp.float32)),
        grid_spec=pltpu.PrefetchScalarGridSpec(
            num_scalar_prefetch=0,
            grid=(pl.cdiv(rows, tm),),
            in_specs=[pl.BlockSpec((tm, in_dim), lambda i: (i, 0)),
                      pl.BlockSpec((in_dim, tot), lambda i: (0, 0)),
                      pl.BlockSpec((1, tot), lambda i: (0, 0))],
            out_specs=[pl.BlockSpec((tm, off_dim), lambda i: (i, 0)),
                       pl.BlockSpec((tm, attw_dim), lambda i: (i, 0))],
        ),
        compiler_params=pltpu.CompilerParams(dimension_semantics=("parallel",)),
    )(x, w, b.reshape(1, tot))


def _deform_core_kernel(val_hbm, off_ref, attn_ref, refxy_ref, wout_ref, bout_ref,
                        out_ref, val_vmem, dma_sem, *,
                        spatial_shapes, level_starts, n_heads, d_head, n_points,
                        use_bf16_mxu):
    # val_hbm  : (N, S_total, C) in HBM (memory_space=pl.ANY)
    # off_ref  : (1, Lq_t, 2*M*L*P)  -- x plane then y plane (lane-contiguous)
    # attn_ref : (1, Lq_t, M*L*P)
    # refxy_ref: (1, Lq_t, 2*L)      -- reference x then reference y, in [0, 1]
    # wout_ref : (C, C), bout_ref : (1, C)   fused output projection
    # out_ref  : (1, Lq_t, C)
    # val_vmem : (S_total, C) VMEM scratch, dma_sem: DMA semaphore
    n = pl.program_id(0)

    # Values are copied once per batch element (q == 0) and reused by every Lq tile:
    # single-buffered by construction (the q grid axis is "arbitrary" -> in-order).
    @pl.when(pl.program_id(1) == 0)
    def _():
        cp = pltpu.make_async_copy(val_hbm.at[n], val_vmem, dma_sem)
        cp.start()
        cp.wait()

    L = len(spatial_shapes)
    M, D, P = n_heads, d_head, n_points
    MLP = M * L * P
    Lq = off_ref.shape[1]
    f32 = jnp.float32

    # Hoisted per-level data shared by all heads and points:
    #   (1, HW) float pixel-coordinate grids + (Lq, 1) reference pixel offsets.
    grids = []
    refs_px = []
    for l in range(L):
        H, W = spatial_shapes[l]
        hw = jax.lax.broadcasted_iota(jnp.int32, (1, H * W), 1)
        h_i = (hw // W).astype(f32)
        w_i = (hw % W).astype(f32)
        grids.append((h_i, w_i))
        # loc*W - 0.5 == ref*W + off - 0.5  (offset normalizer cancels), grid_sample
        # align_corners=False convention.
        rx = refxy_ref[0, :, l:l + 1] * W - 0.5
        ry = refxy_ref[0, :, L + l:L + l + 1] * H - 0.5
        refs_px.append((rx, ry))

    head_outs = []
    for m in range(M):
        acc = jnp.zeros((Lq, D), f32)
        for l in range(L):
            H, W = spatial_shapes[l]
            HW = H * W
            start = level_starts[l]
            h_i, w_i = grids[l]
            rx, ry = refs_px[l]
            base = (m * L + l) * P
            xs = rx + off_ref[0, :, base:base + P]                 # (Lq, P) pixel x
            ys = ry + off_ref[0, :, MLP + base:MLP + base + P]     # (Lq, P) pixel y
            aw = attn_ref[0, :, base:base + P]                     # (Lq, P)
            # Separable tent bilinear weights (padding_mode='zeros'): grid cells farther
            # than 1 pixel get weight 0, out-of-range corners drop out automatically.
            # Fewer full-width VPU passes than floor + one-hot compare/select and no
            # exact-float-equality hazard.
            wmat = jnp.zeros((Lq, HW), f32)
            for p in range(P):
                wy = jnp.maximum(1.0 - jnp.abs(h_i - ys[:, p:p + 1]), 0.0)   # (Lq, HW)
                wx = jnp.maximum(1.0 - jnp.abs(w_i - xs[:, p:p + 1]), 0.0)   # (Lq, HW)
                wmat = wmat + aw[:, p:p + 1] * (wy * wx)
            # Per-level accumulate matmul (no concatenated big-K copy -> smaller VMEM
            # peak; the MXU is far from binding here).
            v_ml = val_vmem[start:start + HW, m * D:(m + 1) * D]             # (HW, D)
            if use_bf16_mxu:   # valid on v5e / v6e / v7x; only matmul operands are cast
                wmat = wmat.astype(jnp.bfloat16)
                v_ml = v_ml.astype(jnp.bfloat16)
            acc = acc + jnp.dot(wmat, v_ml, preferred_element_type=f32)
        head_outs.append(acc)
    # TODO(synk): for very large levels, a separable (Lq,W)@(W,H*D) MXU contraction of
    # wx followed by a wy-weighted H reduction cuts weight build from O(Lq*H*W) to
    # O(Lq*(H+W)) VPU work -- verify with a bundle dump before switching.

    core = jnp.concatenate(head_outs, axis=1)                                # (Lq, C)
    w_o = wout_ref[...]
    if use_bf16_mxu:
        core = core.astype(jnp.bfloat16)
        w_o = w_o.astype(jnp.bfloat16)
    # Fused output projection epilogue; single full-width (lane-dense) store.
    out = jnp.dot(core, w_o, preferred_element_type=f32) + bout_ref[...]
    out_ref[0] = out.astype(out_ref.dtype)


def pallas_deform_attn_core(values, off_flat, attw_flat, refxy, out_w, out_b,
                            spatial_shapes, level_starts, n_heads, n_points,
                            use_bf16_mxu=False):
    # values: (N, S_total, C); off_flat: (N, Lq, 2*M*L*P); attw_flat: (N, Lq, M*L*P);
    # refxy: (N, Lq, 2*L)
    N, S_total, C = values.shape
    _, Lq, _ = off_flat.shape
    M = n_heads
    D = C // M
    P = n_points
    shapes = tuple((int(h), int(w)) for h, w in spatial_shapes)
    starts = tuple(int(s) for s in level_starts)
    L = len(shapes)
    MLP = M * L * P
    assert off_flat.shape[-1] == 2 * MLP
    assert attw_flat.shape[-1] == MLP
    assert refxy.shape[-1] == 2 * L

    lq_tile, vmem_limit = _core_vmem_plan(Lq, S_total, C, shapes)
    grid = (N, pl.cdiv(Lq, lq_tile))

    kernel = partial(_deform_core_kernel, spatial_shapes=shapes, level_starts=starts,
                     n_heads=M, d_head=D, n_points=P, use_bf16_mxu=use_bf16_mxu)
    # TODO(synk): if S_total*C exceeds the VMEM budget, stream the value scratch
    # per-level from HBM with double-buffered make_async_copy instead of one bulk copy.
    return pl.pallas_call(
        kernel,
        out_shape=jax.ShapeDtypeStruct((N, Lq, C), jnp.float32),
        grid_spec=pltpu.PrefetchScalarGridSpec(
            num_scalar_prefetch=0,
            grid=grid,
            in_specs=[
                pl.BlockSpec(memory_space=pl.ANY),                       # values (HBM)
                pl.BlockSpec((1, lq_tile, 2 * MLP), lambda n, q: (n, q, 0)),
                pl.BlockSpec((1, lq_tile, MLP), lambda n, q: (n, q, 0)),
                pl.BlockSpec((1, lq_tile, 2 * L), lambda n, q: (n, q, 0)),
                pl.BlockSpec((C, C), lambda n, q: (0, 0)),
                pl.BlockSpec((1, C), lambda n, q: (0, 0)),
            ],
            out_specs=pl.BlockSpec((1, lq_tile, C), lambda n, q: (n, q, 0)),
            scratch_shapes=[pltpu.VMEM((S_total, C), jnp.float32),
                            pltpu.SemaphoreType.DMA(())],
        ),
        compiler_params=pltpu.CompilerParams(
            # q must be "arbitrary": the value copy runs at q == 0 and is reused by the
            # following Lq tiles of the same batch element; batch stays "parallel" so
            # megacore (v7x) still shards across N.
            dimension_semantics=("parallel", "arbitrary"),
            vmem_limit_bytes=vmem_limit,
        ),
    )(values, off_flat, attw_flat, refxy, out_w, out_b.reshape(1, C))


# ----------------------------------------------------------------------------- module

def _xavier_uniform(key, fan_in, fan_out):
    bound = math.sqrt(6.0 / (fan_in + fan_out))
    return jax.random.uniform(key, (fan_in, fan_out), minval=-bound, maxval=bound,
                              dtype=jnp.float32)


class MSDeformAttnSTATransPairwiseV2:
    """JAX/Pallas port of MSDeformAttn_STATrans_Pairwise_v2 (forward only)."""

    def __init__(self, seq_length, num_iter, d_model=256, n_levels=4, n_heads=8,
                 n_points=4, key=None, use_bf16_mxu=False):
        if d_model % n_heads != 0:
            raise ValueError('d_model must be divisible by n_heads, but got {} and {}'
                             .format(d_model, n_heads))
        _d_per_head = d_model // n_heads
        _is_power_of_2(_d_per_head)  # warning in torch; shapes identical either way
        self.seq_length = seq_length
        self.num_iter = num_iter
        self.im2col_step = 64  # TODO(synk): CUDA im2col batching knob; no-op on TPU
        self.d_model = d_model
        self.n_levels = n_levels
        self.n_heads = n_heads
        self.n_points = n_points
        # bf16 MXU operands (matmul + epilogue) are a throughput win on v5e/v6e/v7x but
        # loosen numerics vs the f32 reference, so default off for the correctness check.
        self.use_bf16_mxu = use_bf16_mxu
        self._reset_parameters(key if key is not None else jax.random.PRNGKey(0))

    def _reset_parameters(self, key):
        M, Lv, P, C = self.n_heads, self.n_levels, self.n_points, self.d_model
        # sampling_offsets: weight = 0, bias = directional grid init (matches torch code)
        self.sampling_offsets_w = jnp.zeros((C, M * Lv * P * 2), jnp.float32)
        thetas = jnp.arange(M, dtype=jnp.float32) * (2.0 * math.pi / M)
        grid_init = jnp.stack([jnp.cos(thetas), jnp.sin(thetas)], -1)
        grid_init = grid_init / jnp.max(jnp.abs(grid_init), axis=-1, keepdims=True)
        grid_init = jnp.tile(grid_init.reshape(M, 1, 1, 2), (1, Lv, P, 1))
        grid_init = grid_init * jnp.arange(1, P + 1, dtype=jnp.float32).reshape(1, 1, P, 1)
        self.sampling_offsets_b = grid_init.reshape(-1)
        # attention_weights: zeros
        self.attention_weights_w = jnp.zeros((C, M * Lv * P), jnp.float32)
        self.attention_weights_b = jnp.zeros((M * Lv * P,), jnp.float32)
        # value/output proj: xavier uniform, zero bias (deterministic via PRNG key)
        k1, k2 = jax.random.split(key)
        self.value_proj_w = _xavier_uniform(k1, C, C)
        self.value_proj_b = jnp.zeros((C,), jnp.float32)
        self.output_proj_w = _xavier_uniform(k2, C, C)
        self.output_proj_b = jnp.zeros((C,), jnp.float32)

        # Fused query-side projection: sampling_offsets columns are re-ordered from
        # (m, l, p, xy) to (xy, m, l, p) so the kernel emits lane-contiguous x / y
        # offset planes, then concatenated with the attention_weights columns so one
        # pallas_call reads each query row tile once.
        so_w_xy = (self.sampling_offsets_w.reshape(C, M, Lv, P, 2)
                   .transpose(0, 4, 1, 2, 3).reshape(C, 2 * M * Lv * P))
        so_b_xy = (self.sampling_offsets_b.reshape(M, Lv, P, 2)
                   .transpose(3, 0, 1, 2).reshape(-1))
        self.qproj_w = jnp.concatenate([so_w_xy, self.attention_weights_w], axis=1)
        self.qproj_b = jnp.concatenate([so_b_xy, self.attention_weights_b], axis=0)

    def __call__(self, query_list, reference_points, input_flatten_list,
                 input_spatial_shapes, input_level_start_index, input_padding_mask=None):
        N, Len_q, _ = query_list[0].shape
        _, Len_in, _ = input_flatten_list[0].shape
        M, Lv, P, C = self.n_heads, self.n_levels, self.n_points, self.d_model
        off_dim = 2 * M * Lv * P

        value_list, off_list, attw_list = [], [], []
        for query, input_flatten in zip(query_list, input_flatten_list):
            v = pallas_linear(input_flatten.reshape(N * Len_in, C),
                              self.value_proj_w, self.value_proj_b).reshape(N, Len_in, C)
            if input_padding_mask is not None:
                # TODO(synk): fuse the padding mask into the value_proj kernel.
                v = jnp.where(input_padding_mask[..., None], 0.0, v)
            value_list.append(v)
            off, aw = pallas_query_proj(query.reshape(N * Len_q, C),
                                        self.qproj_w, self.qproj_b,
                                        n_heads=M, group=Lv * P, off_dim=off_dim)
            off_list.append(off.reshape(N, Len_q, 2, M, Lv, P))
            attw_list.append(aw.reshape(N, Len_q, M, Lv, P))

        assert len(value_list) == self.num_iter
        assert len(off_list) == self.num_iter
        assert len(attw_list) == self.num_iter

        values_temporal = jnp.concatenate(value_list, axis=1)        # (N, S_total, C)
        off_temporal = jnp.concatenate(off_list, axis=-2)            # (N, Lq, 2, M, L_tot, P)
        attw_temporal = jnp.concatenate(attw_list, axis=-2)          # (N, Lq, M, L_tot, P)

        L_total = off_temporal.shape[-2]
        off_flat = off_temporal.reshape(N, Len_q, 2 * M * L_total * P)
        attw_flat = attw_temporal.reshape(N, Len_q, M * L_total * P)
        # pre-split x|y reference points (tiny tensor); the ref-add, pixel scaling and
        # -0.5 shift are all fused into the core kernel (no sampling_locations tensor).
        refxy = jnp.concatenate([reference_points[..., 0], reference_points[..., 1]],
                                axis=-1)                             # (N, Lq, 2*L_total)

        # static metadata for the Pallas kernel (values are host-known)
        shapes_static = [(int(h), int(w)) for h, w in np.asarray(input_spatial_shapes)]
        starts_static = [int(s) for s in np.asarray(input_level_start_index)]

        # deformable-attention core with fused sampling arithmetic + output projection
        out = pallas_deform_attn_core(values_temporal, off_flat, attw_flat, refxy,
                                      self.output_proj_w, self.output_proj_b,
                                      shapes_static, starts_static,
                                      n_heads=M, n_points=P,
                                      use_bf16_mxu=self.use_bf16_mxu)   # (N, Lq, C)
        return out


# ----------------------------------------------------------------------- pure-JAX reference

def _ref_core(values, shapes, starts, loc, attn):
    N, S, M, D = values.shape
    Lq = loc.shape[1]
    out = jnp.zeros((N, Lq, M, D), jnp.float32)
    n_idx = jnp.arange(N)[:, None, None, None]
    m_idx = jnp.arange(M)[None, None, :, None]
    for l, (H, W) in enumerate(shapes):
        start = starts[l]
        v = values[:, start:start + H * W].reshape(N, H, W, M, D).transpose(0, 3, 1, 2, 4)
        x = loc[:, :, :, l, :, 0] * W - 0.5
        y = loc[:, :, :, l, :, 1] * H - 0.5
        x0 = jnp.floor(x).astype(jnp.int32)
        y0 = jnp.floor(y).astype(jnp.int32)
        fx = x - x0
        fy = y - y0

        def g(yy, xx):
            valid = ((yy >= 0) & (yy < H) & (xx >= 0) & (xx < W)).astype(jnp.float32)
            yc = jnp.clip(yy, 0, H - 1)
            xc = jnp.clip(xx, 0, W - 1)
            return v[n_idx, m_idx, yc, xc] * valid[..., None]   # (N, Lq, M, P, D)

        samp = (g(y0, x0) * ((1 - fy) * (1 - fx))[..., None]
                + g(y0, x0 + 1) * ((1 - fy) * fx)[..., None]
                + g(y0 + 1, x0) * (fy * (1 - fx))[..., None]
                + g(y0 + 1, x0 + 1) * (fy * fx)[..., None])
        out = out + jnp.sum(attn[:, :, :, l, :, None] * samp, axis=3)
    return out.reshape(N, Lq, M * D)


def reference_forward(m, query_list, reference_points, input_flatten_list,
                      input_spatial_shapes, input_level_start_index, input_padding_mask=None):
    N, Len_q, _ = query_list[0].shape
    _, Len_in, _ = input_flatten_list[0].shape
    M, Lv, P, C = m.n_heads, m.n_levels, m.n_points, m.d_model
    D = C // M
    value_list, off_list, attw_list = [], [], []
    for query, inp in zip(query_list, input_flatten_list):
        v = inp @ m.value_proj_w + m.value_proj_b
        if input_padding_mask is not None:
            v = jnp.where(input_padding_mask[..., None], 0.0, v)
        value_list.append(v.reshape(N, Len_in, M, D))
        off = query @ m.sampling_offsets_w + m.sampling_offsets_b
        off_list.append(off.reshape(N, Len_q, M, Lv, P, 2))
        aw = (query @ m.attention_weights_w + m.attention_weights_b).reshape(N, Len_q, M, Lv * P)
        aw = jax.nn.softmax(aw, axis=-1)
        attw_list.append(aw.reshape(N, Len_q, M, Lv, P))
    values_temporal = jnp.concatenate(value_list, axis=1)
    off_t = jnp.concatenate(off_list, axis=-3)
    attw_t = jnp.concatenate(attw_list, axis=-2)
    ss = jnp.asarray(input_spatial_shapes)
    offset_normalizer = jnp.stack([ss[..., 1], ss[..., 0]], -1).astype(jnp.float32)
    loc = (reference_points[:, :, None, :, None, :]
           + off_t / offset_normalizer[None, None, None, :, None, :])
    shapes = [(int(h), int(w)) for h, w in np.asarray(input_spatial_shapes)]
    starts = [int(s) for s in np.asarray(input_level_start_index)]
    core = _ref_core(values_temporal, shapes, starts, loc, attw_t)
    return core @ m.output_proj_w + m.output_proj_b


# ----------------------------------------------------------------------------- main

if __name__ == "__main__":
    key = jax.random.PRNGKey(0)
    num_iter = 2
    n_levels = 2          # levels per iteration (module's n_levels)
    n_heads = 4
    n_points = 2
    d_model = 32
    seq_length = 8
    N, Len_q = 2, 8

    per_iter_shapes = [(8, 8), (4, 4)]
    Len_in = sum(h * w for h, w in per_iter_shapes)

    # The caller-side metadata covers num_iter * n_levels "temporal" levels, matching the
    # concat of the per-iteration value sequences.
    shapes_total = per_iter_shapes * num_iter
    starts_total = np.cumsum([0] + [h * w for h, w in shapes_total])[:-1].tolist()
    input_spatial_shapes = jnp.array(shapes_total, dtype=jnp.int32)        # (L_total, 2)
    input_level_start_index = jnp.array(starts_total, dtype=jnp.int32)     # (L_total,)

    keys = jax.random.split(key, 8)
    module = MSDeformAttnSTATransPairwiseV2(seq_length, num_iter, d_model, n_levels,
                                            n_heads, n_points, key=keys[0])
    query_list = [jax.random.normal(keys[1 + i], (N, Len_q, d_model), dtype=jnp.float32)
                  for i in range(num_iter)]
    input_flatten_list = [jax.random.normal(keys[3 + i], (N, Len_in, d_model), dtype=jnp.float32)
                          for i in range(num_iter)]
    reference_points = jax.random.uniform(keys[5], (N, Len_q, len(shapes_total), 2),
                                          dtype=jnp.float32)

    out = module(query_list, reference_points, input_flatten_list,
                 input_spatial_shapes, input_level_start_index, None)
    out = jax.block_until_ready(out)
    assert out.shape == (N, Len_q, d_model)

    ref = reference_forward(module, query_list, reference_points, input_flatten_list,
                            input_spatial_shapes, input_level_start_index, None)
    np.testing.assert_allclose(np.asarray(out), np.asarray(ref), atol=2e-4, rtol=2e-4)

    print("KERNEL_OK")
</pallas_src>

<mosaic_0001>
module attributes {stable_mosaic.version = 11 : i64} {
  func.func @_linear_kernel(%arg0: i32, %arg1: memref<160x32xf32, #tpu.memory_space<vmem>>, %arg2: memref<32x32xf32, #tpu.memory_space<vmem>>, %arg3: memref<1x32xf32, #tpu.memory_space<vmem>>, %arg4: memref<160x32xf32, #tpu.memory_space<vmem>>) attributes {dimension_semantics = [#tpu.dimension_semantics<parallel>], iteration_bounds = array<i64: 1>, scalar_prefetch = 0 : i64, scratch_operands = 0 : i64, tpu.core_type = #tpu.core_type<tc>, window_params = [{transform_indices = @transform_0, window_bounds = array<i64: 160, 32>}, {pipeline_mode = #tpu.pipeline_mode<synchronous>, transform_indices = @transform_1, window_bounds = array<i64: 32, 32>}, {pipeline_mode = #tpu.pipeline_mode<synchronous>, transform_indices = @transform_2, window_bounds = array<i64: 1, 32>}, {transform_indices = @transform_3, window_bounds = array<i64: 160, 32>}]} {
    %c0 = arith.constant 0 : index
    %c0_0 = arith.constant 0 : index
    %0 = vector.load %arg1[%c0, %c0_0] : memref<160x32xf32, #tpu.memory_space<vmem>>, vector<160x32xf32>
    %c0_1 = arith.constant 0 : index
    %c0_2 = arith.constant 0 : index
    %1 = vector.load %arg2[%c0_1, %c0_2] : memref<32x32xf32, #tpu.memory_space<vmem>>, vector<32x32xf32>
    %cst = arith.constant dense<0.000000e+00> : vector<160x32xf32>
    %2 = tpu.matmul %0, %1, %cst {dimension_numbers = #tpu.dot_dimension_numbers<[1], [0], [0], [1], [0, 0, 1, 1], [], []>} : vector<160x32xf32>, vector<32x32xf32>, vector<160x32xf32> -> vector<160x32xf32>
    %c0_3 = arith.constant 0 : index
    %c0_4 = arith.constant 0 : index
    %3 = vector.load %arg3[%c0_3, %c0_4] : memref<1x32xf32, #tpu.memory_space<vmem>>, vector<1x32xf32>
    %4 = vector.broadcast %3 : vector<1x32xf32> to vector<160x32xf32>
    %5 = arith.addf %2, %4 : vector<160x32xf32>
    %c0_5 = arith.constant 0 : index
    %c0_6 = arith.constant 0 : index
    %6 = vector.load %arg4[%c0_5, %c0_6] : memref<160x32xf32, #tpu.memory_space<vmem>>, vector<160x32xf32>
    tpu.vector_store %arg4[%c0_5, %c0_6], %5 {strides = array<i32>} : memref<160x32xf32, #tpu.memory_space<vmem>>, vector<160x32xf32>,
    return
  }
  func.func @transform_0(%arg0: i32) -> (i32, i32) {
    %c0_i32 = arith.constant 0 : i32
    %c0_i32_0 = arith.constant 0 : i32
    return %arg0, %c0_i32 : i32, i32
  }
  func.func @transform_1(%arg0: i32) -> (i32, i32) {
    %c0_i32 = arith.constant 0 : i32
    %c0_i32_0 = arith.constant 0 : i32
    %c0_i32_1 = arith.constant 0 : i32
    return %c0_i32, %c0_i32_0 : i32, i32
  }
  func.func @transform_2(%arg0: i32) -> (i32, i32) {
    %c0_i32 = arith.constant 0 : i32
    %c0_i32_0 = arith.constant 0 : i32
    %c0_i32_1 = arith.constant 0 : i32
    return %c0_i32, %c0_i32_0 : i32, i32
  }
  func.func @transform_3(%arg0: i32) -> (i32, i32) {
    %c0_i32 = arith.constant 0 : i32
    %c0_i32_0 = arith.constant 0 : i32
    return %arg0, %c0_i32 : i32, i32
  }
}

</mosaic_0001>

<bundles_post_ra>
// kernel: tpu_custom_call.1
= control target key start
LH: loop header
LB: loop body
LE: loop exit
PB: predicated region body
PF: predicated region fallthrough
CT: control target
= control target key end

     0   :  { %vm45_vm0 = vcmask 261120   ;;  %s581_s1 = inlined_call_operand.vmem [shape: f32[32,32], index: 1, kind: input, shape index: {}]   ;;  %s582_s0 = inlined_call_operand.vmem [shape: f32[160,32], index: 0, kind: input, shape index: {}]   ;;  %s583_s2 = inlined_call_operand.vmem [shape: f32[1,32], index: 2, kind: input, shape index: {}]   ;;  %s584_s3 = inlined_call_operand.vmem [shape: f32[160,32], index: 3, kind: output, shape index: {}]  }
   0x1   :  { %v37_v0 = vld [vmem:[%s581_s1 + $0x18] sm:$0xff]  ;;  %v36_v1 = vld [vmem:[%s581_s1 + $0x10] sm:$0xff]  ;;  %v35_v2 = vld [vmem:[%s581_s1 + $0x8] sm:$0xff] }
   0x2   :  { %340 = vmatprep.subr.mxu0 %v37_v0  ;;  %378 = vmatprep.subr.mxu1 %v37_v0  ;;  %v34_v3 = vld [vmem:[%s581_s1] sm:$0xff]  ;;  %v24_v5 = vld [vmem:[%s582_s0 + $0x50] sm:$0xff]  ;;  %v15_v6 = vld [vmem:[%s582_s0 + $0x8] sm:$0xff] }
   0x3   :  { %341 = vmatpush3.msra.mxu0 %v37_v0  ;;  %382 = vmatpush3.msra.mxu1 %v37_v0  ;;  %v14_v4 = vld [vmem:[%s582_s0] sm:$0xff]  ;;  %v25_v7 = vld [vmem:[%s582_s0 + $0x58] sm:$0xff]  ;;  %v16_v8 = vld [vmem:[%s582_s0 + $0x10] sm:$0xff] }
   0x4   :  { %342 = vmatprep.subr.mxu0 %v36_v1  ;;  %379 = vmatprep.subr.mxu1 %v36_v1  ;;  %v26_v9 = vld [vmem:[%s582_s0 + $0x60] sm:$0xff]  ;;  %v17_v10 = vld [vmem:[%s582_s0 + $0x18] sm:$0xff]  ;;  %v27_v11 = vld [vmem:[%s582_s0 + $0x68] sm:$0xff] }
   0x5   :  { %343 = vmatpush3.msra.mxu0 %v36_v1  ;;  %383 = vmatpush3.msra.mxu1 %v36_v1  ;;  %v18_v12 = vld [vmem:[%s582_s0 + $0x20] sm:$0xff]  ;;  %v28_v13 = vld [vmem:[%s582_s0 + $0x70] sm:$0xff]  ;;  %v19_v14 = vld [vmem:[%s582_s0 + $0x28] sm:$0xff] }
   0x6   :  { %344 = vmatprep.subr.mxu0 %v35_v2  ;;  %380 = vmatprep.subr.mxu1 %v35_v2  ;;  %v29_v15 = vld [vmem:[%s582_s0 + $0x78] sm:$0xff]  ;;  %v20_v16 = vld [vmem:[%s582_s0 + $0x30] sm:$0xff]  ;;  %v30_v17 = vld [vmem:[%s582_s0 + $0x80] sm:$0xff] }
   0x7   :  { %345 = vmatpush3.msra.mxu0 %v35_v2  ;;  %384 = vmatpush3.msra.mxu1 %v35_v2  ;;  %v21_v18 = vld [vmem:[%s582_s0 + $0x38] sm:$0xff]  ;;  %v31_v19 = vld [vmem:[%s582_s0 + $0x88] sm:$0xff]  ;;  %v22_v20 = vld [vmem:[%s582_s0 + $0x40] sm:$0xff] }
   0x8   :  { %346 = vmatprep.subr.mxu0 %v34_v3  ;;  %381 = vmatprep.subr.mxu1 %v34_v3  ;;  %v32_v21 = vld [vmem:[%s582_s0 + $0x90] sm:$0xff]  ;;  %v23_v22 = vld [vmem:[%s582_s0 + $0x48] sm:$0xff]  ;;  %v33_v23 = vld [vmem:[%s582_s0 + $0x98] sm:$0xff] }
   0x9   :  { %347 = vmatpush3.msra.mxu0 %v34_v3  ;;  %385 = vmatpush3.msra.mxu1 %v34_v3  ;;  %v295_v24 = vld [vmem:[%s583_s2] ss:$0 sm:$0xff] }
   0xa   :  { %348 = vmatprep.mubr.msk.f32.mxu0 %vm45_vm0, %v14_v4  ;;  %363 = vmatprep.mubr.msk.f32.mxu1 %vm45_vm0, %v24_v5 }
   0xb   :  { %349 = vmatmul.mubr.msk.f32.vlgmr.msra.gmra.mxu0 %vm45_vm0, %v15_v6  ;;  %364 = vmatmul.mubr.msk.f32.vlgmr.msra.gmra.mxu1 %vm45_vm0, %v25_v7 }
   0xc   :  { %351 = vmatprep.mubr.msk.f32.mxu0 %vm45_vm0, %v16_v8  ;;  %366 = vmatprep.mubr.msk.f32.mxu1 %vm45_vm0, %v26_v9 }
   0xf   :  { %352 = vmatmul.mubr.msk.f32.gmra.mxu0 %vm45_vm0, %v17_v10  ;;  %367 = vmatmul.mubr.msk.f32.gmra.mxu1 %vm45_vm0, %v27_v11 }
  0x10   :  { %354 = vmatprep.mubr.msk.f32.mxu0 %vm45_vm0, %v18_v12  ;;  %369 = vmatprep.mubr.msk.f32.mxu1 %vm45_vm0, %v28_v13 }
  0x13   :  { %355 = vmatmul.mubr.msk.f32.gmra.mxu0 %vm45_vm0, %v19_v14  ;;  %370 = vmatmul.mubr.msk.f32.gmra.mxu1 %vm45_vm0, %v29_v15 }
  0x14   :  { %357 = vmatprep.mubr.msk.f32.mxu0 %vm45_vm0, %v20_v16  ;;  %372 = vmatprep.mubr.msk.f32.mxu1 %vm45_vm0, %v30_v17 }
  0x17   :  { %358 = vmatmul.mubr.msk.f32.gmra.mxu0 %vm45_vm0, %v21_v18  ;;  %373 = vmatmul.mubr.msk.f32.gmra.mxu1 %vm45_vm0, %v31_v19 }
  0x18   :  { %360 = vmatprep.mubr.msk.f32.mxu0 %vm45_vm0, %v22_v20  ;;  %375 = vmatprep.mubr.msk.f32.mxu1 %vm45_vm0, %v32_v21 }
  0x1b   :  { %361 = vmatmul.mubr.msk.f32.gmra.mxu0 %vm45_vm0, %v23_v22  ;;  %376 = vmatmul.mubr.msk.f32.gmra.mxu1 %vm45_vm0, %v33_v23 }
  0xcb   :  { %v350_v25 = vpop.f32.mrf.mxu0  ;;  %v365_v26 = vpop.f32.mrf.mxu1 }
  0xcc   :  { %v178_v27 = vadd.f32 %v350_v25, %v295_v24  ;;  %v228_v28 = vadd.f32 %v365_v26, %v295_v24 }
  0xcd   :  { %v172_v29 = vpop.f32.mrf.mxu0  ;;  %v222_v30 = vpop.f32.mrf.mxu1 }
  0xce   :  { %272 = vst.msk [vmem:[%s584_s3 + $0x8] sm:$0xff] %vm45_vm0, %v178_v27  ;;  %282 = vst.msk [vmem:[%s584_s3 + $0x58] sm:$0xff] %vm45_vm0, %v228_v28  ;;  %v173_v31 = vadd.f32 %v295_v24, %v172_v29  ;;  %v223_v32 = vadd.f32 %v295_v24, %v222_v30 }
  0xcf   :  { %v353_v33 = vpop.f32.mrf.mxu0  ;;  %v368_v34 = vpop.f32.mrf.mxu1 }
  0xd0   :  { %271 = vst.msk [vmem:[%s584_s3] sm:$0xff] %vm45_vm0, %v173_v31  ;;  %281 = vst.msk [vmem:[%s584_s3 + $0x50] sm:$0xff] %vm45_vm0, %v223_v32  ;;  %v188_v35 = vadd.f32 %v353_v33, %v295_v24  ;;  %v238_v36 = vadd.f32 %v368_v34, %v295_v24 }
  0xd1   :  { %v182_v37 = vpop.f32.mrf.mxu0  ;;  %v232_v38 = vpop.f32.mrf.mxu1 }
  0xd2   :  { %274 = vst.msk [vmem:[%s584_s3 + $0x18] sm:$0xff] %vm45_vm0, %v188_v35  ;;  %284 = vst.msk [vmem:[%s584_s3 + $0x68] sm:$0xff] %vm45_vm0, %v238_v36  ;;  %v183_v39 = vadd.f32 %v295_v24, %v182_v37  ;;  %v233_v40 = vadd.f32 %v295_v24, %v232_v38 }
  0xd3   :  { %v356_v41 = vpop.f32.mrf.mxu0  ;;  %v371_v42 = vpop.f32.mrf.mxu1 }
  0xd4   :  { %273 = vst.msk [vmem:[%s584_s3 + $0x10] sm:$0xff] %vm45_vm0, %v183_v39  ;;  %283 = vst.msk [vmem:[%s584_s3 + $0x60] sm:$0xff] %vm45_vm0, %v233_v40  ;;  %v198_v43 = vadd.f32 %v356_v41, %v295_v24  ;;  %v248_v44 = vadd.f32 %v371_v42, %v295_v24 }
  0xd5   :  { %v192_v45 = vpop.f32.mrf.mxu0  ;;  %v242_v46 = vpop.f32.mrf.mxu1 }
  0xd6   :  { %276 = vst.msk [vmem:[%s584_s3 + $0x28] sm:$0xff] %vm45_vm0, %v198_v43  ;;  %286 = vst.msk [vmem:[%s584_s3 + $0x78] sm:$0xff] %vm45_vm0, %v248_v44  ;;  %v193_v47 = vadd.f32 %v295_v24, %v192_v45  ;;  %v243_v48 = vadd.f32 %v295_v24, %v242_v46 }
  0xd7   :  { %v359_v49 = vpop.f32.mrf.mxu0  ;;  %v374_v50 = vpop.f32.mrf.mxu1 }
  0xd8   :  { %275 = vst.msk [vmem:[%s584_s3 + $0x20] sm:$0xff] %vm45_vm0, %v193_v47  ;;  %285 = vst.msk [vmem:[%s584_s3 + $0x70] sm:$0xff] %vm45_vm0, %v243_v48  ;;  %v208_v51 = vadd.f32 %v359_v49, %v295_v24  ;;  %v258_v52 = vadd.f32 %v374_v50, %v295_v24 }
  0xd9   :  { %v202_v53 = vpop.f32.mrf.mxu0  ;;  %v252_v54 = vpop.f32.mrf.mxu1 }
  0xda   :  { %278 = vst.msk [vmem:[%s584_s3 + $0x38] sm:$0xff] %vm45_vm0, %v208_v51  ;;  %288 = vst.msk [vmem:[%s584_s3 + $0x88] sm:$0xff] %vm45_vm0, %v258_v52  ;;  %v203_v55 = vadd.f32 %v295_v24, %v202_v53  ;;  %v253_v56 = vadd.f32 %v295_v24, %v252_v54 }
  0xdb   :  { %v362_v57 = vpop.f32.mrf.mxu0  ;;  %v377_v58 = vpop.f32.mrf.mxu1 }
  0xdc   :  { %277 = vst.msk [vmem:[%s584_s3 + $0x30] sm:$0xff] %vm45_vm0, %v203_v55  ;;  %287 = vst.msk [vmem:[%s584_s3 + $0x80] sm:$0xff] %vm45_vm0, %v253_v56  ;;  %v218_v59 = vadd.f32 %v362_v57, %v295_v24  ;;  %v268_v60 = vadd.f32 %v377_v58, %v295_v24 }
  0xdd   :  { %v212_v61 = vpop.f32.mrf.mxu0  ;;  %v262_v62 = vpop.f32.mrf.mxu1 }
  0xde   :  { %280 = vst.msk [vmem:[%s584_s3 + $0x48] sm:$0xff] %vm45_vm0, %v218_v59  ;;  %290 = vst.msk [vmem:[%s584_s3 + $0x98] sm:$0xff] %vm45_vm0, %v268_v60  ;;  %v213_v63 = vadd.f32 %v295_v24, %v212_v61  ;;  %v263_v0 = vadd.f32 %v295_v24, %v262_v62 }
  0xe0   :  { %279 = vst.msk [vmem:[%s584_s3 + $0x40] sm:$0xff] %vm45_vm0, %v213_v63  ;;  %289 = vst.msk [vmem:[%s584_s3 + $0x90] sm:$0xff] %vm45_vm0, %v263_v0 }

</bundles_post_ra>
